<compile_context>
chip_gen: v5e
topology: v5e:2x2
jax: 0.10.0
libtpu: 0.0.40
codegen_flags: <defaults>
</compile_context>

<pallas_src>
import functools

import jax
import jax.numpy as jnp
from jax import lax
from jax.experimental import pallas as pl
from jax.experimental.pallas import tpu as pltpu


def _round_up(x, m):
    return (x + m - 1) // m * m


def classifier_kernel(x_ref, wfc_ref, bfc_ref, wcls_ref, bcls_ref, lbl_ref,
                      logits_ref, loss_ref, *, num_cat):
    # x arrives f32; cast to bf16 in-kernel (VPU has slack; avoids an extra
    # wrapper-side pass over x in HBM).
    x = x_ref[...].astype(jnp.bfloat16)            # (TB, D)
    wfc = wfc_ref[...]                             # (D, D)  bf16 (resident)
    bfc = bfc_ref[...]                             # (1, D)  f32  (resident)

    # logits = relu(fc(x)); logits = relu(fc(logits))  -- same fc twice.
    # MXU dots in bf16 with f32 accumulation; bias/ReLU/CE math in f32.
    h = jnp.maximum(jnp.dot(x, wfc, preferred_element_type=jnp.float32) + bfc, 0.0)
    h = jnp.maximum(
        jnp.dot(h.astype(jnp.bfloat16), wfc, preferred_element_type=jnp.float32) + bfc,
        0.0)

    # cls head on a lane-dense (CP=128 wide, zero-padded) VMEM slab.
    logits = jnp.dot(h.astype(wcls_ref.dtype), wcls_ref[...],
                     preferred_element_type=jnp.float32) + bcls_ref[...]   # (TB, CP)

    # Only the first num_cat lanes go back to HBM ((TB, C) output block).
    logits_ref[...] = logits[:, :num_cat]

    # Cross entropy over the first num_cat lanes only (keepdims -> (TB, 1)).
    lane = lax.broadcasted_iota(jnp.int32, logits.shape, 1)                # (TB, CP)
    neg = jnp.finfo(jnp.float32).min
    masked = jnp.where(lane < num_cat, logits, neg)
    m = jnp.max(masked, axis=-1, keepdims=True)                            # (TB, 1)
    lse = m + jnp.log(jnp.sum(jnp.exp(masked - m), axis=-1, keepdims=True))

    labels = lbl_ref[...]                                                  # (TB, 1) int32
    tgt = jnp.sum(jnp.where(lane == labels, logits, 0.0), axis=-1, keepdims=True)

    # Per-row loss; rows of a ragged last tile beyond B are dropped on store.
    loss_ref[...] = lse - tgt


@jax.jit
def classifier_forward(img_embeddings, img_label, w_fc, b_fc, w_cls, b_cls):
    """Returns (logits, loss_value) matching outputs['logits'], outputs['loss_value']."""
    B, D = img_embeddings.shape
    C = w_cls.shape[1]
    CP = max(128, _round_up(C, 128))                 # lane-dense in-kernel slab width

    # Batch tile: big enough to amortize per-step overhead; guarantees >=2 grid
    # steps when B > 8 so v7x megacore can split the parallel batch axis.
    TB = max(8, min(1024, _round_up(pl.cdiv(B, 2), 8)))
    n_tiles = pl.cdiv(B, TB)                         # ragged last tile handled by Pallas

    x = img_embeddings.astype(jnp.float32)           # no pad, no bf16 pass over x
    labels = img_label.astype(jnp.int32).reshape(B, 1)

    # Weight prep (tiny): bf16 MXU operands, cls head zero-padded to CP lanes.
    wfc = w_fc.astype(jnp.bfloat16)
    bfc = b_fc.astype(jnp.float32).reshape(1, D)
    wcls = jnp.zeros((D, CP), jnp.bfloat16).at[:, :C].set(w_cls.astype(jnp.bfloat16))
    bcls = jnp.zeros((1, CP), jnp.float32).at[:, :C].set(b_cls.astype(jnp.float32))

    cost = pl.CostEstimate(
        flops=B * (4 * D * D + 2 * D * CP),
        transcendentals=B * (CP + 1),
        bytes_accessed=(B * D * 4 + 2 * D * D * 2 + D * 4 + D * CP * 2 + CP * 4
                        + B * 4 + B * C * 4 + B * 4),
    )

    grid_spec = pltpu.PrefetchScalarGridSpec(
        num_scalar_prefetch=0,
        grid=(n_tiles,),
        in_specs=[
            pl.BlockSpec((TB, D), lambda i: (i, 0)),    # x       f32   (pipelined)
            pl.BlockSpec((D, D), lambda i: (0, 0)),     # w_fc    bf16  (resident)
            pl.BlockSpec((1, D), lambda i: (0, 0)),     # b_fc    f32   (resident)
            pl.BlockSpec((D, CP), lambda i: (0, 0)),    # w_cls   bf16  (resident, padded)
            pl.BlockSpec((1, CP), lambda i: (0, 0)),    # b_cls   f32   (resident, padded)
            pl.BlockSpec((TB, 1), lambda i: (i, 0)),    # labels  int32 (pipelined)
        ],
        out_specs=(
            pl.BlockSpec((TB, C), lambda i: (i, 0)),    # logits: narrow (B, C) writeback
            pl.BlockSpec((TB, 1), lambda i: (i, 0)),    # per-row loss
        ),
    )

    logits, loss_rows = pl.pallas_call(
        functools.partial(classifier_kernel, num_cat=C),
        out_shape=(
            jax.ShapeDtypeStruct((B, C), jnp.float32),
            jax.ShapeDtypeStruct((B, 1), jnp.float32),
        ),
        grid_spec=grid_spec,
        compiler_params=pltpu.CompilerParams(
            dimension_semantics=("parallel",)),
        cost_estimate=cost,
    )(x, wfc, bfc, wcls, bcls, labels)

    loss = jnp.mean(loss_rows[:, 0])
    # TODO(synk): PyTorch CrossEntropyLoss extras (ignore_index=-100, class
    # weights) are not modeled; labels are assumed in [0, num_cat).
    return logits, loss


def _reference(x, y, w_fc, b_fc, w_cls, b_cls):
    # Mirrors the kernel's numerics: bf16 MXU operands, f32 accumulation/elementwise.
    xb = x.astype(jnp.bfloat16)
    wfcb = w_fc.astype(jnp.bfloat16)
    wclsb = w_cls.astype(jnp.bfloat16)
    bfc = b_fc.astype(jnp.float32)
    bcls = b_cls.astype(jnp.float32)
    h = jax.nn.relu(jnp.dot(xb, wfcb, preferred_element_type=jnp.float32) + bfc)
    h = jax.nn.relu(jnp.dot(h.astype(jnp.bfloat16), wfcb,
                            preferred_element_type=jnp.float32) + bfc)
    logits = jnp.dot(h.astype(jnp.bfloat16), wclsb,
                     preferred_element_type=jnp.float32) + bcls
    logp = jax.nn.log_softmax(logits, axis=-1)
    loss = -jnp.mean(jnp.take_along_axis(logp, y[:, None], axis=-1))
    return logits, loss


if __name__ == "__main__":
    # module-consistent shapes: input_dim=128 (biovil-t), num_cat=3
    D, C = 128, 3

    key = jax.random.PRNGKey(0)
    k1, k2, k3, k4, kx, ky, kx2, ky2 = jax.random.split(key, 8)

    # deterministic params (shapes follow nn.Linear(D, D) / nn.Linear(D, C), stored as (in, out))
    w_fc = jax.random.normal(k1, (D, D), dtype=jnp.float32) * (1.0 / jnp.sqrt(D))
    b_fc = jax.random.normal(k2, (D,), dtype=jnp.float32) * 0.01
    w_cls = jax.random.normal(k3, (D, C), dtype=jnp.float32) * (1.0 / jnp.sqrt(D))
    b_cls = jax.random.normal(k4, (C,), dtype=jnp.float32) * 0.01

    # -- primary check: small batch (B=8), single tile --
    B = 8
    img_embeddings = jax.random.normal(kx, (B, D), dtype=jnp.float32)
    img_label = jax.random.randint(ky, (B,), 0, C, dtype=jnp.int32)
    logits, loss = classifier_forward(img_embeddings, img_label, w_fc, b_fc, w_cls, b_cls)
    jax.block_until_ready((logits, loss))
    ref_logits, ref_loss = _reference(img_embeddings, img_label, w_fc, b_fc, w_cls, b_cls)
    assert logits.shape == (B, C)
    assert jnp.allclose(logits, ref_logits, atol=2e-3, rtol=2e-3)
    assert jnp.allclose(loss, ref_loss, atol=2e-3, rtol=2e-3)

    # -- secondary check: multi-tile grid with ragged last tile (B % TB != 0) --
    B2 = 300
    x2 = jax.random.normal(kx2, (B2, D), dtype=jnp.float32)
    y2 = jax.random.randint(ky2, (B2,), 0, C, dtype=jnp.int32)
    logits2, loss2 = classifier_forward(x2, y2, w_fc, b_fc, w_cls, b_cls)
    jax.block_until_ready((logits2, loss2))
    ref_logits2, ref_loss2 = _reference(x2, y2, w_fc, b_fc, w_cls, b_cls)
    assert logits2.shape == (B2, C)
    assert jnp.allclose(logits2, ref_logits2, atol=2e-3, rtol=2e-3)
    assert jnp.allclose(loss2, ref_loss2, atol=2e-3, rtol=2e-3)

    print("KERNEL_OK")
</pallas_src>

<mosaic_0001>
module attributes {stable_mosaic.version = 11 : i64} {
  func.func @classifier_kernel(%arg0: i32, %arg1: memref<8x128xf32, #tpu.memory_space<vmem>>, %arg2: memref<128x128xbf16, #tpu.memory_space<vmem>>, %arg3: memref<1x128xf32, #tpu.memory_space<vmem>>, %arg4: memref<128x128xbf16, #tpu.memory_space<vmem>>, %arg5: memref<1x128xf32, #tpu.memory_space<vmem>>, %arg6: memref<8x1xi32, #tpu.memory_space<vmem>>, %arg7: memref<8x3xf32, #tpu.memory_space<vmem>>, %arg8: memref<8x1xf32, #tpu.memory_space<vmem>>) attributes {dimension_semantics = [#tpu.dimension_semantics<parallel>], iteration_bounds = array<i64: 1>, scalar_prefetch = 0 : i64, scratch_operands = 0 : i64, tpu.core_type = #tpu.core_type<tc>, window_params = [{transform_indices = @transform_0, window_bounds = array<i64: 8, 128>}, {pipeline_mode = #tpu.pipeline_mode<synchronous>, transform_indices = @transform_1, window_bounds = array<i64: 128, 128>}, {pipeline_mode = #tpu.pipeline_mode<synchronous>, transform_indices = @transform_2, window_bounds = array<i64: 1, 128>}, {pipeline_mode = #tpu.pipeline_mode<synchronous>, transform_indices = @transform_3, window_bounds = array<i64: 128, 128>}, {pipeline_mode = #tpu.pipeline_mode<synchronous>, transform_indices = @transform_4, window_bounds = array<i64: 1, 128>}, {transform_indices = @transform_5, window_bounds = array<i64: 8, 1>}, {transform_indices = @transform_6, window_bounds = array<i64: 8, 3>}, {transform_indices = @transform_7, window_bounds = array<i64: 8, 1>}]} {
    %c0 = arith.constant 0 : index
    %c0_0 = arith.constant 0 : index
    %0 = vector.load %arg1[%c0, %c0_0] : memref<8x128xf32, #tpu.memory_space<vmem>>, vector<8x128xf32>
    %1 = arith.truncf %0 : vector<8x128xf32> to vector<8x128xbf16>
    %c0_1 = arith.constant 0 : index
    %c0_2 = arith.constant 0 : index
    %2 = vector.load %arg2[%c0_1, %c0_2] : memref<128x128xbf16, #tpu.memory_space<vmem>>, vector<128x128xbf16>
    %c0_3 = arith.constant 0 : index
    %c0_4 = arith.constant 0 : index
    %3 = vector.load %arg3[%c0_3, %c0_4] : memref<1x128xf32, #tpu.memory_space<vmem>>, vector<1x128xf32>
    %cst = arith.constant dense<0.000000e+00> : vector<8x128xf32>
    %4 = tpu.matmul %1, %2, %cst {dimension_numbers = #tpu.dot_dimension_numbers<[1], [0], [0], [1], [0, 0, 1, 1], [], []>} : vector<8x128xbf16>, vector<128x128xbf16>, vector<8x128xf32> -> vector<8x128xf32>
    %5 = vector.broadcast %3 : vector<1x128xf32> to vector<8x128xf32>
    %6 = arith.addf %4, %5 : vector<8x128xf32>
    %cst_5 = arith.constant 0.000000e+00 : f32
    %7 = vector.broadcast %cst_5 : f32 to vector<8x128xf32>
    %8 = arith.maximumf %6, %7 : vector<8x128xf32>
    %9 = arith.truncf %8 : vector<8x128xf32> to vector<8x128xbf16>
    %cst_6 = arith.constant dense<0.000000e+00> : vector<8x128xf32>
    %10 = tpu.matmul %9, %2, %cst_6 {dimension_numbers = #tpu.dot_dimension_numbers<[1], [0], [0], [1], [0, 0, 1, 1], [], []>} : vector<8x128xbf16>, vector<128x128xbf16>, vector<8x128xf32> -> vector<8x128xf32>
    %11 = vector.broadcast %3 : vector<1x128xf32> to vector<8x128xf32>
    %12 = arith.addf %10, %11 : vector<8x128xf32>
    %cst_7 = arith.constant 0.000000e+00 : f32
    %13 = vector.broadcast %cst_7 : f32 to vector<8x128xf32>
    %14 = arith.maximumf %12, %13 : vector<8x128xf32>
    %15 = arith.truncf %14 : vector<8x128xf32> to vector<8x128xbf16>
    %c0_8 = arith.constant 0 : index
    %c0_9 = arith.constant 0 : index
    %16 = vector.load %arg4[%c0_8, %c0_9] : memref<128x128xbf16, #tpu.memory_space<vmem>>, vector<128x128xbf16>
    %cst_10 = arith.constant dense<0.000000e+00> : vector<8x128xf32>
    %17 = tpu.matmul %15, %16, %cst_10 {dimension_numbers = #tpu.dot_dimension_numbers<[1], [0], [0], [1], [0, 0, 1, 1], [], []>} : vector<8x128xbf16>, vector<128x128xbf16>, vector<8x128xf32> -> vector<8x128xf32>
    %c0_11 = arith.constant 0 : index
    %c0_12 = arith.constant 0 : index
    %18 = vector.load %arg5[%c0_11, %c0_12] : memref<1x128xf32, #tpu.memory_space<vmem>>, vector<1x128xf32>
    %19 = vector.broadcast %18 : vector<1x128xf32> to vector<8x128xf32>
    %20 = arith.addf %17, %19 : vector<8x128xf32>
    %21 = vector.extract_strided_slice %20 {offsets = [0, 0], sizes = [8, 3], strides = [1, 1]} : vector<8x128xf32> to vector<8x3xf32>
    %c0_13 = arith.constant 0 : index
    %c0_14 = arith.constant 0 : index
    %22 = vector.load %arg7[%c0_13, %c0_14] : memref<8x3xf32, #tpu.memory_space<vmem>>, vector<8x3xf32>
    tpu.vector_store %arg7[%c0_13, %c0_14], %21 {strides = array<i32>} : memref<8x3xf32, #tpu.memory_space<vmem>>, vector<8x3xf32>,
    %23 = tpu.iota {dimensions = array<i32: 1>} : vector<8x128xi32>
    %c3_i32 = arith.constant 3 : i32
    %24 = vector.broadcast %c3_i32 : i32 to vector<8x128xi32>
    %25 = arith.cmpi slt, %23, %24 : vector<8x128xi32>
    %cst_15 = arith.constant -3.40282347E+38 : f32
    %26 = vector.broadcast %cst_15 : f32 to vector<8x128xf32>
    %27 = arith.select %25, %20, %26 : vector<8x128xi1>, vector<8x128xf32>
    %cst_16 = arith.constant dense<0xFF800000> : vector<8xf32>
    %28 = vector.multi_reduction <maximumf>, %27, %cst_16 [1] : vector<8x128xf32> to vector<8xf32>
    %29 = vector.shape_cast %28 : vector<8xf32> to vector<8x1xf32>
    %30 = vector.broadcast %29 : vector<8x1xf32> to vector<8x128xf32>
    %31 = arith.subf %27, %30 : vector<8x128xf32>
    %32 = math.exp %31 : vector<8x128xf32>
    %cst_17 = arith.constant dense<0.000000e+00> : vector<8xf32>
    %33 = vector.multi_reduction <add>, %32, %cst_17 [1] : vector<8x128xf32> to vector<8xf32>
    %34 = vector.shape_cast %33 : vector<8xf32> to vector<8x1xf32>
    %35 = math.log %34 : vector<8x1xf32>
    %36 = arith.addf %29, %35 : vector<8x1xf32>
    %c0_18 = arith.constant 0 : index
    %c0_19 = arith.constant 0 : index
    %37 = vector.load %arg6[%c0_18, %c0_19] : memref<8x1xi32, #tpu.memory_space<vmem>>, vector<8x1xi32>
    %38 = vector.broadcast %37 : vector<8x1xi32> to vector<8x128xi32>
    %39 = arith.cmpi eq, %23, %38 : vector<8x128xi32>
    %cst_20 = arith.constant 0.000000e+00 : f32
    %40 = vector.broadcast %cst_20 : f32 to vector<8x128xf32>
    %41 = arith.select %39, %20, %40 : vector<8x128xi1>, vector<8x128xf32>
    %cst_21 = arith.constant dense<0.000000e+00> : vector<8xf32>
    %42 = vector.multi_reduction <add>, %41, %cst_21 [1] : vector<8x128xf32> to vector<8xf32>
    %43 = vector.shape_cast %42 : vector<8xf32> to vector<8x1xf32>
    %44 = arith.subf %36, %43 : vector<8x1xf32>
    %c0_22 = arith.constant 0 : index
    %c0_23 = arith.constant 0 : index
    %45 = vector.load %arg8[%c0_22, %c0_23] : memref<8x1xf32, #tpu.memory_space<vmem>>, vector<8x1xf32>
    tpu.vector_store %arg8[%c0_22, %c0_23], %44 {strides = array<i32>} : memref<8x1xf32, #tpu.memory_space<vmem>>, vector<8x1xf32>,
    return
  }
  func.func @transform_0(%arg0: i32) -> (i32, i32) {
    %c0_i32 = arith.constant 0 : i32
    %c0_i32_0 = arith.constant 0 : i32
    return %arg0, %c0_i32 : i32, i32
  }
  func.func @transform_1(%arg0: i32) -> (i32, i32) {
    %c0_i32 = arith.constant 0 : i32
    %c0_i32_0 = arith.constant 0 : i32
    %c0_i32_1 = arith.constant 0 : i32
    return %c0_i32, %c0_i32_0 : i32, i32
  }
  func.func @transform_2(%arg0: i32) -> (i32, i32) {
    %c0_i32 = arith.constant 0 : i32
    %c0_i32_0 = arith.constant 0 : i32
    %c0_i32_1 = arith.constant 0 : i32
    return %c0_i32, %c0_i32_0 : i32, i32
  }
  func.func @transform_3(%arg0: i32) -> (i32, i32) {
    %c0_i32 = arith.constant 0 : i32
    %c0_i32_0 = arith.constant 0 : i32
    %c0_i32_1 = arith.constant 0 : i32
    return %c0_i32, %c0_i32_0 : i32, i32
  }
  func.func @transform_4(%arg0: i32) -> (i32, i32) {
    %c0_i32 = arith.constant 0 : i32
    %c0_i32_0 = arith.constant 0 : i32
    %c0_i32_1 = arith.constant 0 : i32
    return %c0_i32, %c0_i32_0 : i32, i32
  }
  func.func @transform_5(%arg0: i32) -> (i32, i32) {
    %c0_i32 = arith.constant 0 : i32
    %c0_i32_0 = arith.constant 0 : i32
    return %arg0, %c0_i32 : i32, i32
  }
  func.func @transform_6(%arg0: i32) -> (i32, i32) {
    %c0_i32 = arith.constant 0 : i32
    %c0_i32_0 = arith.constant 0 : i32
    return %arg0, %c0_i32 : i32, i32
  }
  func.func @transform_7(%arg0: i32) -> (i32, i32) {
    %c0_i32 = arith.constant 0 : i32
    %c0_i32_0 = arith.constant 0 : i32
    return %arg0, %c0_i32 : i32, i32
  }
}

</mosaic_0001>

<bundles_post_ra>
// kernel: classifier_forward.1
= control target key start
LH: loop header
LB: loop body
LE: loop exit
PB: predicated region body
PF: predicated region fallthrough
CT: control target
= control target key end

     0   :  { %v329_v29 = vmov 0   ;;  %v208_v30 = vlaneseq  ;;  %vm206_vm0 = vcmask 23552   ;;  %vm231_vm3 = vcmask 7168   ;;  %s436_s1 = inlined_call_operand.vmem [shape: bf16[128,128], index: 1, kind: input, shape index: {}]   ;;  %s437_s2 = inlined_call_operand.vmem [shape: f32[1,128], index: 2, kind: input, shape index: {}]   ;;  %s438_s0 = inlined_call_operand.vmem [shape: f32[8,128], index: 0, kind: input, shape index: {}]   ;;  %s439_s3 = inlined_call_operand.vmem [shape: bf16[128,128], index: 3, kind: input, shape index: {}]   ;;  %s440_s4 = inlined_call_operand.vmem [shape: f32[1,128], index: 4, kind: input, shape index: {}]   ;;  %s441_s6 = inlined_call_operand.vmem [shape: f32[8,3], index: 6, kind: output, shape index: {0}]   ;;  %s442_s5 = inlined_call_operand.vmem [shape: s32[8,1], index: 5, kind: input, shape index: {}]   ;;  %s443_s7 = inlined_call_operand.vmem [shape: f32[8,1], index: 7, kind: output, shape index: {1}]  }
   0x1   :  { %v312_v0 = vld [vmem:[%s436_s1 + $0x38] sm:$0xff]  ;;  %v311_v1 = vld [vmem:[%s436_s1 + $0x30] sm:$0xff]  ;;  %v310_v2 = vld [vmem:[%s436_s1 + $0x28] sm:$0xff]  ;;  %322 = vset.pattern.permute.xlu0 %v329_v29 }
   0x2   :  { %95 = vmatpush.bf16.msra.mxu0 %v312_v0  ;;  %110 = vmatpush.bf16.msra.mxu1 %v312_v0  ;;  %v309_v3 = vld [vmem:[%s436_s1 + $0x20] sm:$0xff]  ;;  %v308_v4 = vld [vmem:[%s436_s1 + $0x18] sm:$0xff]  ;;  %v307_v5 = vld [vmem:[%s436_s1 + $0x10] sm:$0xff]  ;;  %v209_v31 = vand.u32 127, %v208_v30 }
   0x3   :  { %v306_v6 = vld [vmem:[%s436_s1 + $0x8] sm:$0xff]  ;;  %v305_v7 = vld [vmem:[%s436_s1] sm:$0xff]  ;;  %v320_v10 = vld [vmem:[%s439_s3 + $0x38] sm:$0xff] }
   0x4   :  { %v25_v8 = vld [vmem:[%s438_s0] sm:$0xff]  ;;  %193 = vmatpush.bf16.msra.mxu2 %v320_v10  ;;  %v319_v11 = vld [vmem:[%s439_s3 + $0x30] sm:$0xff]  ;;  %v318_v12 = vld [vmem:[%s439_s3 + $0x28] sm:$0xff]  ;;  %vm210_vm1 = vcmp.lt.s32.totalorder %v209_v31, 3 }
   0x5   :  { %v26_v9 = vpack.c.bf16 %v25_v8, %v25_v8  ;;  %v317_v13 = vld [vmem:[%s439_s3 + $0x20] sm:$0xff]  ;;  %v316_v14 = vld [vmem:[%s439_s3 + $0x18] sm:$0xff]  ;;  %v315_v15 = vld [vmem:[%s439_s3 + $0x10] sm:$0xff] }
   0x6   :  { %96 = vmatpush.bf16.msra.mxu0 %v311_v1  ;;  %111 = vmatpush.bf16.msra.mxu1 %v311_v1  ;;  %v323_v16 = vld [vmem:[%s437_s2] ss:$0 sm:$0xff]  ;;  %v314_v22 = vld [vmem:[%s439_s3 + $0x8] sm:$0xff] }
   0x7   :  { %v313_v23 = vld [vmem:[%s439_s3] sm:$0xff] }
   0x8   :  { %194 = vmatpush.bf16.msra.mxu2 %v319_v11  ;;  %v324_v32 = vld [vmem:[%s440_s4] ss:$0 sm:$0xff] }
   0x9   :  { %v222_v37 = vld [vmem:[%s442_s5] sm:$0xff] }
   0xa   :  { %97 = vmatpush.bf16.msra.mxu0 %v310_v2  ;;  %112 = vmatpush.bf16.msra.mxu1 %v310_v2 }
   0xc   :  { %195 = vmatpush.bf16.msra.mxu2 %v318_v12 }
   0xe   :  { %98 = vmatpush.bf16.msra.mxu0 %v309_v3  ;;  %113 = vmatpush.bf16.msra.mxu1 %v309_v3 }
  0x10   :  { %196 = vmatpush.bf16.msra.mxu2 %v317_v13 }
  0x12   :  { %99 = vmatpush.bf16.msra.mxu0 %v308_v4  ;;  %114 = vmatpush.bf16.msra.mxu1 %v308_v4 }
  0x14   :  { %197 = vmatpush.bf16.msra.mxu2 %v316_v14 }
  0x16   :  { %100 = vmatpush.bf16.msra.mxu0 %v307_v5  ;;  %115 = vmatpush.bf16.msra.mxu1 %v307_v5 }
  0x18   :  { %198 = vmatpush.bf16.msra.mxu2 %v315_v15 }
  0x1a   :  { %101 = vmatpush.bf16.msra.mxu0 %v306_v6  ;;  %116 = vmatpush.bf16.msra.mxu1 %v306_v6 }
  0x1c   :  { %199 = vmatpush.bf16.msra.mxu2 %v314_v22 }
  0x1e   :  { %102 = vmatpush.bf16.msra.mxu0 %v305_v7  ;;  %117 = vmatpush.bf16.msra.mxu1 %v305_v7 }
  0x20   :  { %200 = vmatpush.bf16.msra.mxu2 %v313_v23 }
  0x21   :  { %103 = vmatmul.bf16.vlgmr.msra.gmra.mxu0 %v26_v9 }
  0x9e   :  { %v104_v17 = vpop.f32.mrf.mxu0 }
  0x9f   :  { %v105_v18 = vadd.f32 %v323_v16, %v104_v17 }
  0xa1   :  { %v108_v19 = vmax.f32 %v105_v18, 0.0 }
  0xa3   :  { %v109_v20 = vpack.c.bf16 %v108_v19, %v108_v19 }
  0xa5   :  { %118 = vmatmul.bf16.vlgmr.msra.gmra.mxu1 %v109_v20 }
  0xa6   :  { %v106_v21 = vpop.f32.mrf.mxu0 }
 0x122   :  { %v119_v24 = vpop.f32.mrf.mxu1 }
 0x123   :  { %v120_v25 = vadd.f32 %v323_v16, %v119_v24 }
 0x125   :  { %v123_v26 = vmax.f32 %v120_v25, 0.0 }
 0x127   :  { %v124_v27 = vpack.c.bf16 %v123_v26, %v123_v26 }
 0x129   :  { %201 = vmatmul.bf16.vlgmr.msra.gmra.mxu2 %v124_v27 }
 0x12a   :  { %v121_v28 = vpop.f32.mrf.mxu1 }
 0x1ac   :  { %v202_v33 = vpop.f32.mrf.mxu2 }
 0x1ad   :  { %v203_v34 = vadd.f32 %v324_v32, %v202_v33 }
 0x1af   :  { %207 = vst.msk [vmem:[%s441_s6] sm:$0xff] %vm206_vm0, %v203_v34  ;;  %v211_v35 = vsel %vm210_vm1, %v203_v34, -3.4028235e+38 }
 0x1b0   :  { %212 = vmax.xlane.f32.xlu0 %v211_v35 }
 0x1b4   :  { %v204_v36 = vpop.f32.mrf.mxu2 }
 0x1c4   :  { %224 = vperm.xlu0 %322, %v222_v37  }
 0x223   :  { %v213_v38 = vpop.xlane.xlu0 %212 }
 0x224   :  { %v214_v39 = vsub.f32 %v211_v35, %v213_v38 }
 0x226   :  { %v215_v40 = vmul.f32 1.442695, %v214_v39 }
 0x228   :  { %325 = vpow2.f32 %v215_v40 }
 0x22e   :  { %v326_v41 = vpop.eup %325 }
 0x22f   :  { %217 = vadd.xlane.f32.xlu1 %v326_v41 }
 0x236   :  { %v225_v42 = vpop.permute.xlu0 %224 }
 0x237   :  { %vm226_vm2 = vcmp.eq.s32.totalorder %v209_v31, %v225_v42 }
 0x238   :  { %v227_v43 = vsel %vm226_vm2, %v203_v34, 0.0 }
 0x239   :  { %228 = vadd.xlane.f32.xlu1 %v227_v43 }
 0x2a2   :  { %v218_v44 = vpop.xlane.xlu1 %217 }
 0x2a3   :  { %327 = vlog2.f32 %v218_v44 }
 0x2a9   :  { %v328_v45 = vpop.eup %327 }
 0x2aa   :  { %v220_v46 = vmul.f32 0.6931472, %v328_v45 }
 0x2ac   :  { %v221_v47 = vadd.f32 %v220_v46, %v213_v38  ;;  %v229_v48 = vpop.xlane.xlu1 %228 }
 0x2ae   :  { %v230_v49 = vsub.f32 %v221_v47, %v229_v48 }
 0x2b0   :  { %232 = vst.msk [vmem:[%s443_s7] sm:$0xff] %vm231_vm3, %v230_v49 }

</bundles_post_ra>
